<compile_context>
chip_gen: v7x
topology: tpu7x:2x2x1
jax: 0.10.0
libtpu: 0.0.40
codegen_flags: <defaults>
</compile_context>

<pallas_src>
import functools

import jax
import jax.numpy as jnp
from jax import lax
from jax.experimental import pallas as pl
from jax.experimental.pallas import tpu as pltpu

W1 = 0.7
W2 = 0.3

TARGET_BLOCK_ROWS = 1024   # (1024, 512) f32 block = 2 MiB per input block


def _cdiv(a, b):
    return -(-a // b)


def _joint_loss_kernel(x_ref, t_ref, o_ref, acc_ref, *, w1, w2, block_rows,
                       lane_w, acc_rows, rows_full, rem, needs_mask):
    i = pl.program_id(0)
    last = pl.num_programs(0) - 1

    @pl.when(i == 0)
    def _():
        acc_ref[...] = jnp.zeros_like(acc_ref)

    x = x_ref[...].astype(jnp.float32)
    t = t_ref[...].astype(jnp.float32)

    # Numerically stable BCE with logits (== F.binary_cross_entropy_with_logits):
    #   max(x, 0) - x*t + log1p(exp(-|x|))
    bce = jnp.maximum(x, 0.0) - x * t + jnp.log1p(jnp.exp(-jnp.abs(x)))
    se = (x - t) * (x - t)
    fused = w1 * bce + w2 * se

    def _fold(v):
        # Fold the (block_rows, lane_w) block into the small (acc_rows, lane_w)
        # accumulator with cross-vreg VALU adds (no XLU, no big acc load/store).
        if block_rows % 8 == 0 and block_rows > acc_rows:
            return v.reshape(block_rows // acc_rows, acc_rows, lane_w).sum(axis=0)
        return v

    if needs_mask:
        # Hot path: every block except the last is fully valid — no mask ops.
        @pl.when(i < last)
        def _():
            acc_ref[...] += _fold(fused)

        # Cold path (last block only): mask rows/lanes beyond n_elems
        # (partial-block garbage and, in the rare pad fallback, zero padding).
        @pl.when(i == last)
        def _():
            g_row = i * block_rows + lax.broadcasted_iota(
                jnp.int32, (block_rows, lane_w), 0)
            valid = g_row < rows_full
            if rem:
                lane = lax.broadcasted_iota(jnp.int32, (block_rows, lane_w), 1)
                valid = valid | ((g_row == rows_full) & (lane < rem))
            acc_ref[...] += _fold(jnp.where(valid, fused, 0.0))
    else:
        acc_ref[...] += _fold(fused)

    @pl.when(i == last)
    def _():
        total = jnp.sum(acc_ref[...])
        o_ref[...] = jnp.full(o_ref.shape, total, dtype=jnp.float32)


def joint_loss(input_arr, target_arr, w1=W1, w2=W2):
    """JointLoss(BCEWithLogits, MSE, w1, w2) over arbitrary-shaped tensors."""
    assert input_arr.shape == target_arr.shape
    n_elems = int(input_arr.size)
    assert n_elems > 0

    # Lane-dense slab width: largest of {512, 256, 128} dividing n_elems.
    lane_w = next((lw for lw in (512, 256, 128) if n_elems % lw == 0), None)

    x = jnp.reshape(input_arr, (-1,))      # metadata-only (contiguous reshape)
    t = jnp.reshape(target_arr, (-1,))
    if lane_w is None:
        # Rare fallback (n_elems not a multiple of 128): pad with zeros.  This
        # is the only case that materializes a copy; padded elements are masked
        # out in-kernel so they contribute nothing to the loss.
        lane_w = 128
        pad = (-n_elems) % lane_w
        x = jnp.pad(x, (0, pad))
        t = jnp.pad(t, (0, pad))

    rows_arr = x.size // lane_w
    x2d = x.reshape(rows_arr, lane_w)      # metadata-only
    t2d = t.reshape(rows_arr, lane_w)

    if rows_arr >= 32:
        # Multiple of 32 keeps the block sublane-aligned for any input dtype.
        block_rows = min(TARGET_BLOCK_ROWS, (rows_arr // 32) * 32)
    else:
        block_rows = rows_arr              # tiny input: single full-dim block
    num_blocks = _cdiv(rows_arr, block_rows)
    acc_rows = 8 if block_rows % 8 == 0 else block_rows

    rows_full = n_elems // lane_w          # rows completely filled with valid data
    rem = n_elems % lane_w                 # valid lanes in the single partial row
    needs_mask = (num_blocks * block_rows * lane_w) != n_elems

    in_bytes = jnp.dtype(input_arr.dtype).itemsize
    tg_bytes = jnp.dtype(target_arr.dtype).itemsize

    kernel = functools.partial(
        _joint_loss_kernel, w1=float(w1), w2=float(w2),
        block_rows=block_rows, lane_w=lane_w, acc_rows=acc_rows,
        rows_full=rows_full, rem=rem, needs_mask=needs_mask)

    out = pl.pallas_call(
        kernel,
        out_shape=jax.ShapeDtypeStruct((8, 128), jnp.float32),
        grid_spec=pltpu.PrefetchScalarGridSpec(
            num_scalar_prefetch=0,
            grid=(num_blocks,),
            in_specs=[
                pl.BlockSpec((block_rows, lane_w), lambda i: (i, 0)),
                pl.BlockSpec((block_rows, lane_w), lambda i: (i, 0)),
            ],
            out_specs=pl.BlockSpec((8, 128), lambda i: (0, 0)),
            scratch_shapes=[pltpu.VMEM((acc_rows, lane_w), jnp.float32)],
        ),
        compiler_params=pltpu.CompilerParams(
            dimension_semantics=("arbitrary",),
            vmem_limit_bytes=32 * 1024 * 1024),
        cost_estimate=pl.CostEstimate(
            flops=12 * n_elems,
            transcendentals=2 * n_elems,
            bytes_accessed=rows_arr * lane_w * (in_bytes + tg_bytes) + 8 * 128 * 4),
    )(x2d, t2d)

    # TODO(synk): on v7x (2 TensorCores) add a leading CORE_PARALLEL grid axis
    # (or pl.core_map over a tensorcore mesh) to split the row range across
    # cores for ~2x HBM pull; single-TC v5e/v6e gain nothing from it.
    return out[0, 0] / jnp.float32(n_elems)


def _reference(input_arr, target_arr, w1=W1, w2=W2):
    x = input_arr.astype(jnp.float32)
    t = target_arr.astype(jnp.float32)
    bce = jnp.mean(jnp.maximum(x, 0.0) - x * t + jnp.log1p(jnp.exp(-jnp.abs(x))))
    mse = jnp.mean((x - t) ** 2)
    return w1 * bce + w2 * mse


if __name__ == "__main__":
    key = jax.random.PRNGKey(0)

    shapes = [
        (2, 4, 16, 16),   # divisible case: no pad, no mask, single block
        (5, 4, 32, 32),   # partial last block: in-kernel mask, zero HBM copies
        (2, 3, 17, 19),   # not a multiple of 128: tiny pad fallback + lane mask
    ]
    for shape in shapes:
        key, k1, k2 = jax.random.split(key, 3)
        x = jax.random.normal(k1, shape, dtype=jnp.float32)
        t = jax.random.uniform(k2, shape, dtype=jnp.float32)  # soft targets in [0,1]
        loss = jax.block_until_ready(joint_loss(x, t))
        ref = jax.block_until_ready(_reference(x, t))
        assert jnp.allclose(loss, ref, rtol=1e-4, atol=1e-5), (shape, loss, ref)

    print("KERNEL_OK")
</pallas_src>

<mosaic_0001>
module attributes {stable_mosaic.version = 11 : i64} {
  func.func @_joint_loss_kernel(%arg0: i32, %arg1: memref<4x512xf32, #tpu.memory_space<vmem>>, %arg2: memref<4x512xf32, #tpu.memory_space<vmem>>, %arg3: memref<8x128xf32, #tpu.memory_space<vmem>>, %arg4: memref<4x512xf32, #tpu.memory_space<vmem>>) attributes {dimension_semantics = [#tpu.dimension_semantics<arbitrary>], iteration_bounds = array<i64: 1>, scalar_prefetch = 0 : i64, scratch_operands = 1 : i64, tpu.core_type = #tpu.core_type<tc>, window_params = [{transform_indices = @transform_0, window_bounds = array<i64: 4, 512>}, {transform_indices = @transform_1, window_bounds = array<i64: 4, 512>}, {pipeline_mode = #tpu.pipeline_mode<synchronous>, transform_indices = @transform_2, window_bounds = array<i64: 8, 128>}]} {
    %c0_i32 = arith.constant 0 : i32
    %0 = arith.cmpi eq, %arg0, %c0_i32 : i32
    %1 = arith.extui %0 : i1 to i32
    %c0_i32_0 = arith.constant 0 : i32
    %2 = arith.cmpi ne, %1, %c0_i32_0 : i32
    scf.if %2 {
      %cst_13 = arith.constant 0.000000e+00 : f32
      %29 = vector.broadcast %cst_13 : f32 to vector<4x512xf32>
      %c0_14 = arith.constant 0 : index
      %c0_15 = arith.constant 0 : index
      %30 = vector.load %arg4[%c0_14, %c0_15] : memref<4x512xf32, #tpu.memory_space<vmem>>, vector<4x512xf32>
      tpu.vector_store %arg4[%c0_14, %c0_15], %29 {strides = array<i32>} : memref<4x512xf32, #tpu.memory_space<vmem>>, vector<4x512xf32>,
    } else {
    }
    %c0 = arith.constant 0 : index
    %c0_1 = arith.constant 0 : index
    %3 = vector.load %arg1[%c0, %c0_1] : memref<4x512xf32, #tpu.memory_space<vmem>>, vector<4x512xf32>
    %c0_2 = arith.constant 0 : index
    %c0_3 = arith.constant 0 : index
    %4 = vector.load %arg2[%c0_2, %c0_3] : memref<4x512xf32, #tpu.memory_space<vmem>>, vector<4x512xf32>
    %cst = arith.constant 0.000000e+00 : f32
    %5 = vector.broadcast %cst : f32 to vector<4x512xf32>
    %6 = arith.maximumf %3, %5 : vector<4x512xf32>
    %7 = arith.mulf %3, %4 : vector<4x512xf32>
    %8 = arith.subf %6, %7 : vector<4x512xf32>
    %9 = math.absf %3 : vector<4x512xf32>
    %cst_4 = arith.constant 0.000000e+00 : f32
    %10 = vector.broadcast %cst_4 : f32 to vector<4x512xf32>
    %11 = arith.subf %10, %9 : vector<4x512xf32>
    %12 = math.exp %11 : vector<4x512xf32>
    %13 = math.log1p %12 : vector<4x512xf32>
    %14 = arith.addf %8, %13 : vector<4x512xf32>
    %15 = arith.subf %3, %4 : vector<4x512xf32>
    %16 = arith.subf %3, %4 : vector<4x512xf32>
    %17 = arith.mulf %15, %16 : vector<4x512xf32>
    %cst_5 = arith.constant 0.699999988 : f32
    %18 = vector.broadcast %cst_5 : f32 to vector<4x512xf32>
    %19 = arith.mulf %18, %14 : vector<4x512xf32>
    %cst_6 = arith.constant 3.000000e-01 : f32
    %20 = vector.broadcast %cst_6 : f32 to vector<4x512xf32>
    %21 = arith.mulf %20, %17 : vector<4x512xf32>
    %22 = arith.addf %19, %21 : vector<4x512xf32>
    %c0_7 = arith.constant 0 : index
    %c0_8 = arith.constant 0 : index
    %23 = vector.load %arg4[%c0_7, %c0_8] : memref<4x512xf32, #tpu.memory_space<vmem>>, vector<4x512xf32>
    %24 = arith.addf %23, %22 : vector<4x512xf32>
    %c0_9 = arith.constant 0 : index
    %c0_10 = arith.constant 0 : index
    %25 = vector.load %arg4[%c0_9, %c0_10] : memref<4x512xf32, #tpu.memory_space<vmem>>, vector<4x512xf32>
    tpu.vector_store %arg4[%c0_9, %c0_10], %24 {strides = array<i32>} : memref<4x512xf32, #tpu.memory_space<vmem>>, vector<4x512xf32>,
    %c0_i32_11 = arith.constant 0 : i32
    %26 = arith.cmpi eq, %arg0, %c0_i32_11 : i32
    %27 = arith.extui %26 : i1 to i32
    %c0_i32_12 = arith.constant 0 : i32
    %28 = arith.cmpi ne, %27, %c0_i32_12 : i32
    scf.if %28 {
      %c0_13 = arith.constant 0 : index
      %c0_14 = arith.constant 0 : index
      %29 = vector.load %arg4[%c0_13, %c0_14] : memref<4x512xf32, #tpu.memory_space<vmem>>, vector<4x512xf32>
      %30 = vector.shape_cast %29 : vector<4x512xf32> to vector<1x4x512xf32>
      %cst_15 = arith.constant dense<0.000000e+00> : vector<1xf32>
      %31 = vector.multi_reduction <add>, %30, %cst_15 [1, 2] : vector<1x4x512xf32> to vector<1xf32>
      %32 = vector.shape_cast %31 : vector<1xf32> to vector<1x1x1xf32>
      %33 = vector.extract %32[0, 0, 0] : f32 from vector<1x1x1xf32>
      %34 = vector.broadcast %33 : f32 to vector<8x128xf32>
      %c0_16 = arith.constant 0 : index
      %c0_17 = arith.constant 0 : index
      %35 = vector.load %arg3[%c0_16, %c0_17] : memref<8x128xf32, #tpu.memory_space<vmem>>, vector<8x128xf32>
      tpu.vector_store %arg3[%c0_16, %c0_17], %34 {strides = array<i32>} : memref<8x128xf32, #tpu.memory_space<vmem>>, vector<8x128xf32>,
    } else {
    }
    return
  }
  func.func @transform_0(%arg0: i32) -> (i32, i32) {
    %c0_i32 = arith.constant 0 : i32
    %c0_i32_0 = arith.constant 0 : i32
    return %arg0, %c0_i32 : i32, i32
  }
  func.func @transform_1(%arg0: i32) -> (i32, i32) {
    %c0_i32 = arith.constant 0 : i32
    %c0_i32_0 = arith.constant 0 : i32
    return %arg0, %c0_i32 : i32, i32
  }
  func.func @transform_2(%arg0: i32) -> (i32, i32) {
    %c0_i32 = arith.constant 0 : i32
    %c0_i32_0 = arith.constant 0 : i32
    %c0_i32_1 = arith.constant 0 : i32
    return %c0_i32, %c0_i32_0 : i32, i32
  }
}

</mosaic_0001>

<bundles_post_ra>
// kernel: tpu_custom_call.1
= control target key start
LH: loop header
LB: loop body
LE: loop exit
PB: predicated region body
PF: predicated region fallthrough
CT: control target
= control target key end

     0   :  { %7 = vsyncpa [#allocation4], 0  ;;  %s281_s0 = inlined_call_operand.hbm [shape: f32[4,512], index: 0, kind: input, shape index: {}]   ;;  %s282_s1 = inlined_call_operand.hbm [shape: f32[4,512], index: 1, kind: input, shape index: {}]   ;;  %s283_s2 = inlined_call_operand.hbm [shape: f32[8,128], index: 2, kind: output, shape index: {}]  }
   0x1   :  { %8 = vsyncpa [#allocation7], 0 }
   0x2   :  { %9 = vsyncpa [#allocation5], 0  ;;  %s227_s9 = smov [#allocation3]   ;;  %s228_s11 = smov [#allocation6]  }
   0x3   :  { %s16_s10 = sshll.u32 %s227_s9, 4  ;;  %s26_s12 = sshll.u32 %s228_s11, 4  ;;  %s17_s10 = int_to_ptr.vmem [resolvable:$true] %s16_s10  ;;  %s27_s12 = int_to_ptr.vmem [resolvable:$true] %s26_s12 }
   0x4   :  { %s155_s15 = scalar_lea.hbm %s281_s0, 256 }
   0x5   :  { %p156_p0 = scmp.ne.s32.totalorder %s281_s0, %s155_s15  ;;  %p159_p1 = scmp.lt.u32.totalorder %s155_s15, %s281_s0 }
   0x7   :  { %p161_p2 = pnand %p159_p1, %p156_p0 }
   0x9   :  { %164 = shalt.err (!%p161_p2)
}
   0xa   :  { %s165_s20 = scalar_lea.vmem %s17_s10, 256  ;;  %p170_p4 = scmp.lt.s32.totalorder %s17_s10, %s17_s10 }
   0xb   :  { %p166_p3 = scmp.ne.s32.totalorder %s17_s10, %s165_s20  ;;  %p171_p5 = scmp.lt.s32.totalorder %s165_s20, %s165_s20 }
   0xd   :  { %p172_p6 = por %p171_p5, %p170_p4 }
   0xf   :  { %p173_p7 = pnand %p172_p6, %p166_p3 }
  0x11   :  { %176 = shalt.err (!%p173_p7)
}
  0x12   :  { %19 = dma.hbm_to_vmem [thread:$0]  %s281_s0, 256, %s17_s10, [#allocation4]  }
  0x13   :  { %s177_s25 = scalar_lea.hbm %s282_s1, 256 }
  0x14   :  { %p178_p8 = scmp.ne.s32.totalorder %s282_s1, %s177_s25  ;;  %p181_p9 = scmp.lt.u32.totalorder %s177_s25, %s282_s1 }
  0x16   :  { %p183_p10 = pnand %p181_p9, %p178_p8 }
  0x18   :  { %186 = shalt.err (!%p183_p10)
}
  0x19   :  { %s187_s30 = scalar_lea.vmem %s27_s12, 256  ;;  %p192_p12 = scmp.lt.s32.totalorder %s27_s12, %s27_s12 }
  0x1a   :  { %p188_p11 = scmp.ne.s32.totalorder %s27_s12, %s187_s30  ;;  %p193_p13 = scmp.lt.s32.totalorder %s187_s30, %s187_s30 }
  0x1c   :  { %p194_p0 = por %p193_p13, %p192_p12 }
  0x1e   :  { %p195_p1 = pnand %p194_p0, %p188_p11 }
  0x20   :  { %198 = shalt.err (!%p195_p1)
}
  0x21   :  { %29 = dma.hbm_to_vmem [thread:$0]  %s282_s1, 256, %s27_s12, [#allocation7]  }
  0x22   :  { %221 = dma.done.wait [#allocation4], 256  }
  0x23   :  { %222 = vsyncadd [#allocation4], 4294967040 }
  0x24   :  { %223 = dma.done.wait [#allocation7], 256  }
  0x25   :  { %224 = vsyncadd [#allocation7], 4294967040  ;;  %v42_v0 = vld [vmem:[#allocation3] sm:$0xff]  ;;  %v43_v1 = vld [vmem:[#allocation3 + $0x8] sm:$0xff]  ;;  %vm107_vm2 = vcmask 1043456   ;;  %s229_s1 = smov [#allocation8]  }
  0x26   :  { %v52_v2 = vand.u32 2147483647, %v42_v0  ;;  %v53_v3 = vand.u32 2147483647, %v43_v1  ;;  %v44_v14 = vld [vmem:[#allocation6] sm:$0xff]  ;;  %v45_v15 = vld [vmem:[#allocation6 + $0x8] sm:$0xff] }
  0x27   :  { %v46_v16 = vmax.f32 %v42_v0, 0.0  ;;  %v48_v18 = vmul.f32 %v44_v14, %v42_v0  ;;  %v80_v21 = vsub.f32 %v42_v0, %v44_v14  ;;  %v47_v22 = vmax.f32 %v43_v1, 0.0  ;;  %s132_s4 = sshll.u32 %s229_s1, 4  ;;  %s133_s4 = int_to_ptr.vmem [resolvable:$true] %s132_s4 }
  0x28   :  { %v54_v4 = vsub.f32 0.0, %v52_v2  ;;  %v55_v5 = vsub.f32 0.0, %v53_v3  ;;  %v49_v23 = vmul.f32 %v45_v15, %v43_v1  ;;  %v81_v25 = vsub.f32 %v43_v1, %v45_v15  ;;  %s199_s6 = scalar_lea.vmem %s133_s4, 128  ;;  %p204_p3 = scmp.lt.s32.totalorder %s133_s4, %s133_s4 }
  0x29   :  { %v50_v28 = vsub.f32 %v46_v16, %v48_v18  ;;  %v82_v30 = vmul.f32 %v80_v21, %v80_v21  ;;  %p200_p2 = scmp.ne.s32.totalorder %s133_s4, %s199_s6  ;;  %p205_p4 = scmp.lt.s32.totalorder %s199_s6, %s199_s6 }
  0x2a   :  { %v56_v6 = vmul.f32 1.442695, %v54_v4  ;;  %v58_v7 = vmul.f32 1.442695, %v55_v5  ;;  %v51_v32 = vsub.f32 %v47_v22, %v49_v23  ;;  %v83_v34 = vmul.f32 %v81_v25, %v81_v25 }
  0x2b   :  { %v86_v39 = vmul.f32 0.3, %v82_v30  ;;  %p206_p5 = por %p205_p4, %p204_p3 }
  0x2c   :  { %147 = vpow2.f32 %v56_v6  ;;  %v87_v41 = vmul.f32 0.3, %v83_v34 }
  0x2d   :  { %149 = vpow2.f32 %v58_v7  ;;  %p207_p6 = pnand %p206_p5, %p200_p2 }
  0x36   :  { %v148_v8 = vpop.eup %147 }
  0x37   :  { %v150_v9 = vpop.eup %149  ;;  %v60_v10 = vadd.f32 1.0, %v148_v8  ;;  %v63_v12 = vmul.f32 -0.5, %v148_v8  ;;  %v66_v19 = vand.u32 2147483647, %v148_v8 }
  0x38   :  { %v69_v11 = vadd.f32 1.0, %v150_v9  ;;  %v72_v13 = vmul.f32 -0.5, %v150_v9  ;;  %v75_v24 = vand.u32 2147483647, %v150_v9 }
  0x39   :  { %151 = vlog2.f32 %v60_v10  ;;  %v64_v17 = vadd.f32 1.0, %v63_v12  ;;  %vm67_vm0 = vcmp.lt.f32.partialorder %v66_v19, 0.0004427343 }
  0x3a   :  { %153 = vlog2.f32 %v69_v11  ;;  %v73_v20 = vadd.f32 1.0, %v72_v13  ;;  %vm76_vm1 = vcmp.lt.f32.partialorder %v75_v24, 0.0004427343 }
  0x3b   :  { %v65_v26 = vmul.f32 %v148_v8, %v64_v17 }
  0x3c   :  { %v74_v29 = vmul.f32 %v150_v9, %v73_v20 }
  0x43   :  { %v152_v27 = vpop.eup %151 }
  0x44   :  { %v154_v31 = vpop.eup %153  ;;  %v62_v33 = vmul.f32 0.6931472, %v152_v27 }
  0x45   :  { %v71_v35 = vmul.f32 0.6931472, %v154_v31 }
  0x46   :  { %v68_v36 = vsel %vm67_vm0, %v65_v26, %v62_v33 }
  0x47   :  { %v77_v37 = vsel %vm76_vm1, %v74_v29, %v71_v35  ;;  %v78_v38 = vadd.f32 %v68_v36, %v50_v28 }
  0x48   :  { %v79_v40 = vadd.f32 %v77_v37, %v51_v32 }
  0x49   :  { %v84_v42 = vmul.f32 0.7, %v78_v38 }
  0x4a   :  { %v85_v43 = vmul.f32 0.7, %v79_v40 }
  0x4b   :  { %v88_v44 = vadd.f32 %v86_v39, %v84_v42 }
  0x4c   :  { %v89_v45 = vadd.f32 %v87_v41, %v85_v43 }
  0x4d   :  { %v103_v46 = vcombine.high %v88_v44, %v88_v44  ;;  %v108_v47 = vsel %vm107_vm2, %v88_v44, 0.0 }
  0x4e   :  { %v104_v48 = vcombine.high %v89_v45, %v89_v45  ;;  %v111_v50 = vsel %vm107_vm2, %v89_v45, 0.0 }
  0x4f   :  { %v109_v49 = vsel %vm107_vm2, %v103_v46, 0.0 }
  0x50   :  { %v110_v51 = vadd.f32 %v109_v49, %v108_v47  ;;  %v113_v52 = vsel %vm107_vm2, %v104_v48, 0.0 }
  0x52   :  { %v112_v53 = vadd.f32 %v111_v50, %v110_v51 }
  0x54   :  { %v114_v54 = vadd.f32 %v113_v52, %v112_v53 }
  0x56   :  { %115 = vadd.xlane.f32.xlu0 %v114_v54 }
  0xe3   :  { %v116_v55 = vpop.xlane.xlu0 %115 }
  0xe4   :  { %v117_v56 = vrot.slane %v116_v55, 4 }
  0xe6   :  { %v118_v57 = vadd.f32 %v117_v56, %v116_v55 }
  0xe8   :  { %v119_v58 = vrot.slane %v118_v57, 2 }
  0xea   :  { %v120_v59 = vadd.f32 %v119_v58, %v118_v57 }
  0xec   :  { %v121_v60 = vrot.slane %v120_v59, 1 }
  0xee   :  { %v122_v61 = vadd.f32 %v121_v60, %v120_v59 }
  0xf0   :  { %142 = vpush %v122_v61 }
 0x121   :  { %s143_s5 = spop %142 }
 0x122   :  { %v124_v62 = vstv %s143_s5 }
 0x123   :  { %125 = vst [vmem:[#allocation8] sm:$0xff] %v124_v62 }
 0x124   :  { %210 = shalt.err (!%p207_p6)
}
 0x125   :  { %s211_s9 = scalar_lea.hbm %s283_s2, 128 }
 0x126   :  { %p212_p7 = scmp.ne.s32.totalorder %s283_s2, %s211_s9  ;;  %p215_p8 = scmp.lt.u32.totalorder %s211_s9, %s283_s2 }
 0x128   :  { %p217_p9 = pnand %p215_p8, %p212_p7 }
 0x12a   :  { %220 = shalt.err (!%p217_p9)
}
 0x12b   :  { %135 = dma.vmem_to_hbm [thread:$0]  %s133_s4, 128, %s283_s2, [#allocation5]  }
 0x12c   :  { %225 = dma.done.wait [#allocation5], 128  }
 0x12d   :  { %226 = vsyncadd [#allocation5], 4294967168 }
 0x12e   :  { %139 = vsyncpa [#allocation4], 1 }
 0x12f   :  { %140 = vsyncpa [#allocation7], 1 }
 0x130   :  { %141 = vsyncpa [#allocation5], 1 }

</bundles_post_ra>
